<compile_context>
chip_gen: v6e
topology: v6e:2x2x1
jax: 0.10.0
libtpu: 0.0.40
codegen_flags: <defaults>
</compile_context>

<pallas_src>
import jax
import jax.numpy as jnp
from jax.experimental import pallas as pl
from jax.experimental.pallas import tpu as pltpu


def _actnorm_kernel(x_ref, s_ref, l_ref, o_ref):
    # x_ref: (TILE_R, TILE_S) activations tile, rows = (batch, channel), cols = spatial
    # s_ref: (TILE_R, 1) per-row scale      l_ref: (TILE_R, 1) per-row loc
    o_ref[...] = x_ref[...] * s_ref[...] + l_ref[...]


def _pick_tiles(rows, cols):
    """Pick a lane-dense tile that divides the problem and stays VMEM-friendly."""
    # Lane (last) dim: large multiple of 128 when possible.
    tile_s = cols
    for cand in (4096, 2048, 1024, 512, 256, 128):
        if cols % cand == 0:
            tile_s = cand
            break
    # Sublane dim: cap tile at ~4 MiB f32 so double-buffered in+out tiles stay
    # well under the 32 MiB default scoped VMEM limit (and v7x's 64 MiB total).
    max_elems = 1 << 20
    tile_r = rows
    for cand in (512, 256, 128, 64, 32, 16, 8):
        if rows % cand == 0 and cand * tile_s <= max_elems:
            tile_r = cand
            break
    return tile_r, tile_s


def _actnorm_affine(x2, scale_rows, loc_rows):
    """x2: [R, S] f32; scale_rows/loc_rows: [R, 1] f32.  Returns x2*scale+loc."""
    rows, cols = x2.shape
    tile_r, tile_s = _pick_tiles(rows, cols)
    grid = (rows // tile_r, cols // tile_s)

    cost = pl.CostEstimate(
        flops=2 * rows * cols,
        transcendentals=0,
        bytes_accessed=2 * rows * cols * 4 + 2 * rows * 4,
    )

    return pl.pallas_call(
        _actnorm_kernel,
        out_shape=jax.ShapeDtypeStruct((rows, cols), x2.dtype),
        grid_spec=pltpu.PrefetchScalarGridSpec(
            num_scalar_prefetch=0,
            grid=grid,
            in_specs=[
                pl.BlockSpec((tile_r, tile_s), lambda i, j: (i, j)),  # activations
                pl.BlockSpec((tile_r, 1), lambda i, j: (i, 0)),       # scale column
                pl.BlockSpec((tile_r, 1), lambda i, j: (i, 0)),       # loc column
            ],
            out_specs=pl.BlockSpec((tile_r, tile_s), lambda i, j: (i, j)),
        ),
        compiler_params=pltpu.CompilerParams(
            dimension_semantics=("parallel", "parallel")
        ),
        cost_estimate=cost,
    )(x2, scale_rows, loc_rows)


def actnorm_initialize(x):
    """Data-dependent init mirroring ActNorm.initialize (one-time, not hot path).

    Returns (loc, scale) each of shape [C].
    """
    # TODO(synk): the one-shot mean/std reduction (and the PyTorch 'initialized'
    # buffer / .item() host control flow) is left in plain JAX; it runs once.
    mean = jnp.mean(x, axis=(0, 2, 3))
    std = jnp.std(x, axis=(0, 2, 3), ddof=1)  # torch.std is unbiased by default
    loc = -mean
    scale = 1.0 / (std + 1e-06)
    return loc.astype(jnp.float32), scale.astype(jnp.float32)


def actnorm_forward(x, loc, scale, reverse=False):
    """ActNorm forward.

    Args:
      x:     [B, C, H, W] float32 (NCHW, matching the PyTorch module)
      loc:   [C] float32
      scale: [C] float32
      reverse: if True computes (x - loc) / scale and negates logdet.

    Returns:
      out:    [B, C, H, W] float32
      logdet: [B] float32
    """
    b, c, h, w = x.shape
    hw = h * w

    loc = loc.reshape(-1)
    scale = scale.reshape(-1)

    if reverse:
        # (x - loc) / scale  ==  x * (1/scale) + (-loc/scale): reuse the same kernel.
        eff_scale = 1.0 / scale
        eff_loc = -loc / scale
    else:
        eff_scale = scale
        eff_loc = loc

    # NCHW is already [B*C, H*W] with the big spatial dim on the lane axis: no transpose.
    x2 = x.reshape(b * c, hw)
    scale_rows = jnp.tile(eff_scale, b).reshape(b * c, 1)
    loc_rows = jnp.tile(eff_loc, b).reshape(b * c, 1)

    out2 = _actnorm_affine(x2, scale_rows, loc_rows)
    out = out2.reshape(b, c, h, w)

    # O(C) scalar reduction — plain JAX glue.
    logdet_scalar = jnp.sum(jnp.log(jnp.abs(scale))) * (h * w)
    if reverse:
        logdet_scalar = -logdet_scalar
    logdet = jnp.broadcast_to(logdet_scalar, (b,)).astype(jnp.float32)

    return out, logdet


if __name__ == "__main__":
    key = jax.random.PRNGKey(0)
    k_x = key

    B, C, H, W = 2, 4, 16, 16
    x = jax.random.normal(k_x, (B, C, H, W), dtype=jnp.float32)

    # Mirror the module's first call: initialized == 0 -> data-dependent init.
    loc, scale = actnorm_initialize(x)

    out, logdet = actnorm_forward(x, loc, scale, reverse=False)
    jax.block_until_ready(out)
    jax.block_until_ready(logdet)

    # Sanity check against plain-JAX reference.
    out_ref = x * scale[None, :, None, None] + loc[None, :, None, None]
    logdet_ref = jnp.broadcast_to(jnp.sum(jnp.log(jnp.abs(scale))) * (H * W), (B,))
    assert out.shape == (B, C, H, W)
    assert logdet.shape == (B,)
    assert jnp.allclose(out, out_ref, atol=1e-5), "actnorm affine mismatch"
    assert jnp.allclose(logdet, logdet_ref, atol=1e-4), "logdet mismatch"

    # Also check the reverse path round-trips.
    x_rec, logdet_rev = actnorm_forward(out, loc, scale, reverse=True)
    jax.block_until_ready(x_rec)
    assert jnp.allclose(x_rec, x, atol=1e-4), "reverse round-trip mismatch"
    assert jnp.allclose(logdet_rev, -logdet_ref, atol=1e-4), "reverse logdet mismatch"

    print("KERNEL_OK")
</pallas_src>

<mosaic_0001>
module attributes {stable_mosaic.version = 11 : i64} {
  func.func @_actnorm_kernel(%arg0: i32, %arg1: i32, %arg2: memref<8x256xf32, #tpu.memory_space<vmem>>, %arg3: memref<8x1xf32, #tpu.memory_space<vmem>>, %arg4: memref<8x1xf32, #tpu.memory_space<vmem>>, %arg5: memref<8x256xf32, #tpu.memory_space<vmem>>) attributes {dimension_semantics = [#tpu.dimension_semantics<parallel>, #tpu.dimension_semantics<parallel>], iteration_bounds = array<i64: 1, 1>, scalar_prefetch = 0 : i64, scratch_operands = 0 : i64, tpu.core_type = #tpu.core_type<tc>, window_params = [{transform_indices = @transform_0, window_bounds = array<i64: 8, 256>}, {transform_indices = @transform_1, window_bounds = array<i64: 8, 1>}, {transform_indices = @transform_2, window_bounds = array<i64: 8, 1>}, {transform_indices = @transform_3, window_bounds = array<i64: 8, 256>}]} {
    %c0 = arith.constant 0 : index
    %c0_0 = arith.constant 0 : index
    %0 = vector.load %arg2[%c0, %c0_0] : memref<8x256xf32, #tpu.memory_space<vmem>>, vector<8x256xf32>
    %c0_1 = arith.constant 0 : index
    %c0_2 = arith.constant 0 : index
    %1 = vector.load %arg3[%c0_1, %c0_2] : memref<8x1xf32, #tpu.memory_space<vmem>>, vector<8x1xf32>
    %2 = vector.broadcast %1 : vector<8x1xf32> to vector<8x256xf32>
    %3 = arith.mulf %0, %2 : vector<8x256xf32>
    %c0_3 = arith.constant 0 : index
    %c0_4 = arith.constant 0 : index
    %4 = vector.load %arg4[%c0_3, %c0_4] : memref<8x1xf32, #tpu.memory_space<vmem>>, vector<8x1xf32>
    %5 = vector.broadcast %4 : vector<8x1xf32> to vector<8x256xf32>
    %6 = arith.addf %3, %5 : vector<8x256xf32>
    %c0_5 = arith.constant 0 : index
    %c0_6 = arith.constant 0 : index
    %7 = vector.load %arg5[%c0_5, %c0_6] : memref<8x256xf32, #tpu.memory_space<vmem>>, vector<8x256xf32>
    tpu.vector_store %arg5[%c0_5, %c0_6], %6 {strides = array<i32>} : memref<8x256xf32, #tpu.memory_space<vmem>>, vector<8x256xf32>,
    return
  }
  func.func @transform_0(%arg0: i32, %arg1: i32) -> (i32, i32) {
    %c0_i32 = arith.constant 0 : i32
    return %arg0, %arg1 : i32, i32
  }
  func.func @transform_1(%arg0: i32, %arg1: i32) -> (i32, i32) {
    %c0_i32 = arith.constant 0 : i32
    %c0_i32_0 = arith.constant 0 : i32
    return %arg0, %c0_i32 : i32, i32
  }
  func.func @transform_2(%arg0: i32, %arg1: i32) -> (i32, i32) {
    %c0_i32 = arith.constant 0 : i32
    %c0_i32_0 = arith.constant 0 : i32
    return %arg0, %c0_i32 : i32, i32
  }
  func.func @transform_3(%arg0: i32, %arg1: i32) -> (i32, i32) {
    %c0_i32 = arith.constant 0 : i32
    return %arg0, %arg1 : i32, i32
  }
}

</mosaic_0001>

<bundles_post_ra>
// kernel: tpu_custom_call.1
= control target key start
LH: loop header
LB: loop body
LE: loop exit
PB: predicated region body
PF: predicated region fallthrough
CT: control target
= control target key end

     0   :  { %v74_v1 = vmov 0   ;;  %s111_s0 = inlined_call_operand.vmem [shape: f32[8,256], index: 0, kind: input, shape index: {}]   ;;  %s112_s1 = inlined_call_operand.vmem [shape: f32[8,1], index: 1, kind: input, shape index: {}]   ;;  %s113_s2 = inlined_call_operand.vmem [shape: f32[8,1], index: 2, kind: input, shape index: {}]   ;;  %s114_s3 = inlined_call_operand.hbm [shape: f32[8,256], index: 3, kind: output, shape index: {}]  }
   0x1   :  { %v17_v0 = vld [vmem:[%s112_s1] sm:$0xff]  ;;  %51 = vset.pattern.permute.xlu0 %v74_v1 }
   0x2   :  { %8 = vsyncpa [#allocation3], 0  ;;  %20 = vperm.xlu0 %51, %v17_v0   ;;  %v25_v2 = vld [vmem:[%s113_s2] sm:$0xff]  ;;  %v16_v5 = vld [vmem:[%s111_s0 + $0x8] sm:$0xff]  ;;  %s75_s20 = smov [#allocation2]  }
   0x3   :  { %v15_v4 = vld [vmem:[%s111_s0] sm:$0xff]  ;;  %s41_s1 = sshll.u32 %s75_s20, 4  ;;  %s42_s1 = int_to_ptr.vmem [resolvable:$true] %s41_s1 }
   0x4   :  { %s52_s2 = scalar_lea.vmem %s42_s1, 256  ;;  %p57_p1 = scmp.lt.s32.totalorder %s42_s1, %s42_s1 }
   0x5   :  { %p53_p0 = scmp.ne.s32.totalorder %s42_s1, %s52_s2  ;;  %p58_p2 = scmp.lt.s32.totalorder %s52_s2, %s52_s2 }
   0x6   :  { %28 = vperm.xlu0 %51, %v25_v2  }
   0x7   :  { %p59_p3 = por %p58_p2, %p57_p1 }
   0x9   :  { %p60_p4 = pnand %p59_p3, %p53_p0 }
  0x7d   :  { %v21_v3 = vpop.permute.xlu0 %20 }
  0x7e   :  { %v23_v6 = vmul.f32 %v21_v3, %v15_v4  ;;  %v24_v7 = vmul.f32 %v21_v3, %v16_v5 }
  0x81   :  { %v29_v8 = vpop.permute.xlu0 %28 }
  0x82   :  { %v31_v9 = vadd.f32 %v29_v8, %v23_v6  ;;  %v32_v10 = vadd.f32 %v29_v8, %v24_v7 }
  0x84   :  { %33 = vst [vmem:[#allocation2] sm:$0xff] %v31_v9  ;;  %34 = vst [vmem:[#allocation2 + $0x8] sm:$0xff] %v32_v10 }
  0x85   :  { %63 = shalt.err (!%p60_p4)
}
  0x86   :  { %44 = dma.vmem_to_hbm [thread:$0]  %s42_s1, 256, %s114_s3, [#allocation3]  }
  0x87   :  { %72 = dma.done.wait [#allocation3], 256  }
  0x88   :  { %73 = vsyncadd [#allocation3], 4294967040 }
  0x89   :  { %48 = vsyncpa [#allocation3], 1 }

</bundles_post_ra>
